<compile_context>
chip_gen: v7x
topology: tpu7x:2x2x1
jax: 0.10.0
libtpu: 0.0.40
codegen_flags: <defaults>
</compile_context>

<pallas_src>
import jax
import jax.numpy as jnp
from jax.experimental import pallas as pl
from jax.experimental.pallas import tpu as pltpu

_MIB = 1024 * 1024
# Double-buffered tile budget: keeps the working set well under v7x's 64 MiB
# physical VMEM (v5e/v6e have 128 MiB, so this is conservative there).
_TILE_BUDGET = 40 * _MIB


def _round_up(n, m):
    return ((n + m - 1) // m) * m


def _patch_embed_kernel(x_ref, w_ref, b_ref, o_ref):
    # (TM, K) @ (K, TE) on the MXU with f32 accumulation, + bias, cast to out dtype.
    acc = jnp.dot(x_ref[...], w_ref[...], preferred_element_type=jnp.float32)
    o_ref[...] = (acc + b_ref[...].astype(jnp.float32)).astype(o_ref.dtype)


def _pick_tiles(M, K, E, in_bytes, out_bytes):
    """Pick (tm, te) so the double-buffered working set fits _TILE_BUDGET.

    Prefers te == E (n_e == 1) so the weight/bias tiles are DMA'd exactly once
    and stay VMEM-resident while patch rows stream past them.
    """
    def need(tm, te):
        return (2 * tm * K * in_bytes      # patches  (x2: double buffered)
                + 2 * K * te * in_bytes    # weight
                + 2 * te * 4               # bias (f32)
                + 2 * tm * te * out_bytes) # output

    te_cands = [E] + ([1024] if E > 1024 else [])
    if M <= 128:
        # One full-M block: always layout-legal (block dim == full dim) and no
        # padding needed.  (Tiny inputs leave one v7x core idle by design.)
        tm_cands = [M]
    else:
        tm_cands = [1024, 512, 256, 128]   # multiples of 16 for bf16 sublanes

    chosen = None
    for te_c in te_cands:
        for tm_c in tm_cands:
            if need(tm_c, te_c) <= _TILE_BUDGET:
                chosen = (tm_c, te_c)
                break
        if chosen is not None:
            break
    if chosen is None:                      # absurd-K corner: smallest tiles
        chosen = (tm_cands[-1], te_cands[-1])
    tm, te = chosen

    # v7x megacore: make sure the (parallel) M axis has >= 2 tiles so both
    # TensorCores get work; on single-core chips this costs one extra grid
    # step (~0.35 us).  Also guarantees tm <= M, avoiding block > array dims.
    if M > 128 and pl.cdiv(M, tm) == 1:
        tm = _round_up((M + 1) // 2, 16)

    return tm, te, need(tm, te)


def patch_embed_matmul(patches, weight, bias, *, out_dtype, tm, te,
                       m_outer=True, vmem_limit_bytes=None):
    """patches (M, K) @ weight (K, E) + bias (1, E) -> (M, E) out_dtype.

    Ragged M / E tiles are handled by Pallas (cdiv grid + masked edge blocks);
    K is never tiled, so no reduction axis / accumulator scratch is needed.
    """
    M, K = patches.shape
    Kw, E = weight.shape
    assert K == Kw and bias.shape == (1, E)

    n_m = pl.cdiv(M, tm)
    n_e = pl.cdiv(E, te)

    # Grid-order-aware traffic estimate (the operand whose block index follows
    # the OUTER axis is DMA'd once; the other is re-streamed n_outer times).
    in_b = patches.dtype.itemsize
    w_b = weight.dtype.itemsize
    if m_outer:
        streamed = M * K * in_b + K * E * w_b * n_m
    else:
        streamed = M * K * in_b * n_e + K * E * w_b
    cost = pl.CostEstimate(
        flops=2 * M * K * E,
        transcendentals=0,
        bytes_accessed=(streamed
                        + bias.size * bias.dtype.itemsize
                        + M * E * jnp.dtype(out_dtype).itemsize),
    )

    if m_outer:
        grid = (n_m, n_e)
        pat_map = lambda i, j: (i, 0)
        w_map = lambda i, j: (0, j)
        b_map = lambda i, j: (0, j)
        out_map = lambda i, j: (i, j)
    else:
        grid = (n_e, n_m)
        pat_map = lambda j, i: (i, 0)
        w_map = lambda j, i: (0, j)
        b_map = lambda j, i: (0, j)
        out_map = lambda j, i: (i, j)

    return pl.pallas_call(
        _patch_embed_kernel,
        out_shape=jax.ShapeDtypeStruct((M, E), out_dtype),
        grid_spec=pltpu.PrefetchScalarGridSpec(
            num_scalar_prefetch=0,
            grid=grid,
            in_specs=[
                pl.BlockSpec((tm, K), pat_map),   # patch rows stream
                pl.BlockSpec((K, te), w_map),     # resident when n_e == 1
                pl.BlockSpec((1, te), b_map),
            ],
            out_specs=pl.BlockSpec((tm, te), out_map),
        ),
        compiler_params=pltpu.CompilerParams(
            dimension_semantics=("parallel", "parallel"),
            vmem_limit_bytes=vmem_limit_bytes),
        cost_estimate=cost,
    )(patches, weight, bias)


def patch_embed_forward(x, conv_weight, conv_bias, patch_size,
                        *, out_dtype=jnp.bfloat16, compute_dtype=jnp.bfloat16):
    """Forward pass of PatchEmbed.

    x           : (B, C, H, W)      NCHW, like the PyTorch module
    conv_weight : (E, C, ph, pw)    PyTorch nn.Conv2d weight layout
    conv_bias   : (E,)
    returns     : (B, num_patches, E) in out_dtype

    compute_dtype=bf16 intentionally diverges from PyTorch's f32 Conv2d (MXU
    still accumulates in f32); pass compute_dtype=jnp.float32 for exact-width
    inputs, out_dtype=jnp.float32 for an f32 result.
    """
    B, C, H, W = x.shape
    ph, pw = patch_size
    assert H % ph == 0 and W % pw == 0, "image size must match model"
    gh, gw = H // ph, W // pw
    E = conv_weight.shape[0]
    K = C * ph * pw
    M = B * gh * gw

    # Patch extraction stays outside the kernel as a SINGLE fused XLA pass
    # (convert + transpose writing bf16 patches directly); there is no jnp.pad
    # copy and no output slicing because the BlockSpecs below use full-dim /
    # cdiv (ragged) blocks.
    # TODO(synk): pulling the extraction fully into the kernel (grid over B,
    # x block (1, C, gh_chunk, ph, W), reorder in VMEM) would halve input-side
    # HBM traffic, but the (C,ph,gw,pw)->(gw,K) reorder is a cross-lane
    # relayout that Mosaic lowers slowly/unreliably and the finer grid adds
    # ~0.35 us/step; deliberately not taken unless profiling shows the XLA
    # transpose dominating.
    xb = x.astype(compute_dtype)
    patches = (xb.reshape(B, C, gh, ph, gw, pw)
                 .transpose(0, 2, 4, 1, 3, 5)
                 .reshape(M, K))

    w = conv_weight.reshape(E, K).T.astype(compute_dtype)   # (K, E)
    b = conv_bias.reshape(1, E).astype(jnp.float32)         # (1, E)

    in_bytes = jnp.dtype(compute_dtype).itemsize
    out_bytes = jnp.dtype(out_dtype).itemsize
    tm, te, need = _pick_tiles(M, K, E, in_bytes, out_bytes)

    n_m, n_e = pl.cdiv(M, tm), pl.cdiv(E, te)
    # When E has to be tiled (n_e > 1) choose the grid axis order that
    # re-streams the smaller operand; with n_e == 1 the weight/bias are
    # fetched exactly once regardless.
    if n_e > 1:
        m_outer = (K * E * in_bytes) * (n_m - 1) <= (M * K * in_bytes) * (n_e - 1)
    else:
        m_outer = True

    # Scoped-VMEM limit from the actual tile bytes (+25% & 2 MiB headroom for
    # Mosaic scratch), floored at 32 MiB and capped at v7x's 64 MiB physical.
    vmem_limit = int(min(max(need * 1.25 + 2 * _MIB, 32 * _MIB), 64 * _MIB))

    out = patch_embed_matmul(patches, w, b, out_dtype=out_dtype, tm=tm, te=te,
                             m_outer=m_outer, vmem_limit_bytes=vmem_limit)
    # norm_layer=None -> nn.Identity()
    return out.reshape(B, gh * gw, E)


if __name__ == "__main__":
    def conv_ref(x, w, b, patch):
        # Exact PyTorch semantics: f32 strided Conv2d + flatten(2).transpose(1,2).
        y = jax.lax.conv_general_dilated(
            x, w, window_strides=patch, padding="VALID",
            dimension_numbers=("NCHW", "OIHW", "NCHW"))
        y = y + b.reshape(1, -1, 1, 1)
        return y.reshape(y.shape[0], y.shape[1], -1).transpose(0, 2, 1)

    key = jax.random.PRNGKey(0)

    # ---- case 1: tiny shapes, single-block grid -------------------------
    B, C, H, W = 2, 4, 16, 16
    PATCH = (4, 4)
    EMBED = 32
    kx, kw, kb = jax.random.split(jax.random.fold_in(key, 0), 3)
    x = jax.random.normal(kx, (B, C, H, W), dtype=jnp.float32)
    cw = 0.02 * jax.random.normal(kw, (EMBED, C, PATCH[0], PATCH[1]),
                                  dtype=jnp.float32)
    cb = 0.01 * jax.random.normal(kb, (EMBED,), dtype=jnp.float32)

    out = jax.block_until_ready(patch_embed_forward(x, cw, cb, PATCH))
    gh, gw = H // PATCH[0], W // PATCH[1]
    assert out.shape == (B, gh * gw, EMBED) and out.dtype == jnp.bfloat16
    ref = conv_ref(x, cw, cb, PATCH)
    err = float(jnp.max(jnp.abs(out.astype(jnp.float32) - ref)))
    assert err < 3e-2, f"case1 bf16-out err={err}"

    # f32-output knob (same kernel, f32 stores).
    out_f32 = jax.block_until_ready(
        patch_embed_forward(x, cw, cb, PATCH, out_dtype=jnp.float32))
    assert out_f32.dtype == jnp.float32
    err = float(jnp.max(jnp.abs(out_f32 - ref)))
    assert err < 2e-2, f"case1 f32-out err={err}"

    # ---- case 2: multi-tile M grid with a ragged last block --------------
    B, C, H, W = 6, 3, 80, 80
    PATCH = (16, 16)
    EMBED = 64
    kx, kw, kb = jax.random.split(jax.random.fold_in(key, 1), 3)
    x = jax.random.normal(kx, (B, C, H, W), dtype=jnp.float32)
    cw = 0.02 * jax.random.normal(kw, (EMBED, C, PATCH[0], PATCH[1]),
                                  dtype=jnp.float32)
    cb = 0.01 * jax.random.normal(kb, (EMBED,), dtype=jnp.float32)

    out = jax.block_until_ready(patch_embed_forward(x, cw, cb, PATCH))
    gh, gw = H // PATCH[0], W // PATCH[1]
    assert out.shape == (B, gh * gw, EMBED) and out.dtype == jnp.bfloat16
    ref = conv_ref(x, cw, cb, PATCH)
    err = float(jnp.max(jnp.abs(out.astype(jnp.float32) - ref)))
    assert err < 5e-2, f"case2 bf16-out err={err}"

    print("KERNEL_OK")
</pallas_src>

<mosaic_0001>
module attributes {stable_mosaic.version = 11 : i64} {
  func.func @_patch_embed_kernel(%arg0: i32, %arg1: i32, %arg2: memref<32x64xbf16, #tpu.memory_space<vmem>>, %arg3: memref<64x32xbf16, #tpu.memory_space<vmem>>, %arg4: memref<1x32xf32, #tpu.memory_space<vmem>>, %arg5: memref<32x32xbf16, #tpu.memory_space<vmem>>) attributes {dimension_semantics = [#tpu.dimension_semantics<parallel>, #tpu.dimension_semantics<parallel>], iteration_bounds = array<i64: 1, 1>, scalar_prefetch = 0 : i64, scratch_operands = 0 : i64, tpu.core_type = #tpu.core_type<tc>, window_params = [{transform_indices = @transform_0, window_bounds = array<i64: 32, 64>}, {transform_indices = @transform_1, window_bounds = array<i64: 64, 32>}, {transform_indices = @transform_2, window_bounds = array<i64: 1, 32>}, {transform_indices = @transform_3, window_bounds = array<i64: 32, 32>}]} {
    %c0 = arith.constant 0 : index
    %c0_0 = arith.constant 0 : index
    %0 = vector.load %arg2[%c0, %c0_0] : memref<32x64xbf16, #tpu.memory_space<vmem>>, vector<32x64xbf16>
    %c0_1 = arith.constant 0 : index
    %c0_2 = arith.constant 0 : index
    %1 = vector.load %arg3[%c0_1, %c0_2] : memref<64x32xbf16, #tpu.memory_space<vmem>>, vector<64x32xbf16>
    %cst = arith.constant dense<0.000000e+00> : vector<32x32xf32>
    %2 = tpu.matmul %0, %1, %cst {dimension_numbers = #tpu.dot_dimension_numbers<[1], [0], [0], [1], [0, 0, 1, 1], [], []>} : vector<32x64xbf16>, vector<64x32xbf16>, vector<32x32xf32> -> vector<32x32xf32>
    %c0_3 = arith.constant 0 : index
    %c0_4 = arith.constant 0 : index
    %3 = vector.load %arg4[%c0_3, %c0_4] : memref<1x32xf32, #tpu.memory_space<vmem>>, vector<1x32xf32>
    %4 = vector.broadcast %3 : vector<1x32xf32> to vector<32x32xf32>
    %5 = arith.addf %2, %4 : vector<32x32xf32>
    %6 = arith.truncf %5 : vector<32x32xf32> to vector<32x32xbf16>
    %c0_5 = arith.constant 0 : index
    %c0_6 = arith.constant 0 : index
    %7 = vector.load %arg5[%c0_5, %c0_6] : memref<32x32xbf16, #tpu.memory_space<vmem>>, vector<32x32xbf16>
    tpu.vector_store %arg5[%c0_5, %c0_6], %6 {strides = array<i32>} : memref<32x32xbf16, #tpu.memory_space<vmem>>, vector<32x32xbf16>,
    return
  }
  func.func @transform_0(%arg0: i32, %arg1: i32) -> (i32, i32) {
    %c0_i32 = arith.constant 0 : i32
    %c0_i32_0 = arith.constant 0 : i32
    return %arg0, %c0_i32 : i32, i32
  }
  func.func @transform_1(%arg0: i32, %arg1: i32) -> (i32, i32) {
    %c0_i32 = arith.constant 0 : i32
    %c0_i32_0 = arith.constant 0 : i32
    return %c0_i32, %arg1 : i32, i32
  }
  func.func @transform_2(%arg0: i32, %arg1: i32) -> (i32, i32) {
    %c0_i32 = arith.constant 0 : i32
    %c0_i32_0 = arith.constant 0 : i32
    return %c0_i32, %arg1 : i32, i32
  }
  func.func @transform_3(%arg0: i32, %arg1: i32) -> (i32, i32) {
    %c0_i32 = arith.constant 0 : i32
    return %arg0, %arg1 : i32, i32
  }
}

</mosaic_0001>

<bundles_post_ra>
// kernel: tpu_custom_call.1
= control target key start
LH: loop header
LB: loop body
LE: loop exit
PB: predicated region body
PF: predicated region fallthrough
CT: control target
= control target key end

     0   :  { %vm69_vm0 = vcmask 523264   ;;  %s290_s0 = inlined_call_operand.vmem [shape: bf16[32,64], index: 0, kind: input, shape index: {}]   ;;  %s291_s1 = inlined_call_operand.vmem [shape: bf16[64,32], index: 1, kind: input, shape index: {}]   ;;  %s292_s2 = inlined_call_operand.vmem [shape: f32[1,32], index: 2, kind: input, shape index: {}]   ;;  %s293_s3 = inlined_call_operand.hbm [shape: bf16[32,32], index: 3, kind: output, shape index: {}]  }
   0x1   :  { %v200_v0 = vld [vmem:[%s291_s1] sm:$0xff]   ;;  %v201_v1 = vld [vmem:[%s291_s1 + $0x8] sm:$0xff]   ;;  %v202_v2 = vld [vmem:[%s291_s1 + $0x10] sm:$0xff]  }
   0x2   :  { %185 = vmatprep.subr.bf16.mxu0 %v200_v0  ;;  %v204_v3 = vld [vmem:[%s290_s0] sm:$0xff]  }
   0x3   :  { %186 = vmatpush3.bf16.msra.mxu0 %v200_v0  ;;  %193 = vmatprep.mubr.msk.bf16.mxu0 %vm69_vm0, %v204_v3 }
   0x4   :  { %187 = vmatprep.subr.bf16.mxu0 %v201_v1 }
   0x5   :  { %8 = vsyncpa [#allocation3], 0  ;;  %v203_v4 = vld [vmem:[%s291_s1 + $0x18] sm:$0xff]   ;;  %v205_v5 = vld [vmem:[%s290_s0 + $0x8] sm:$0xff]   ;;  %vm141_vm1 = vcmask 257024   ;;  %s230_s26 = smov [#allocation2]  }
   0x6   :  { %v162_v6 = vld [vmem:[%s292_s2] ss:$0 sm:$0xff]  ;;  %s151_s1 = sshll.u32 %s230_s26, 4  ;;  %s152_s1 = int_to_ptr.vmem [resolvable:$true] %s151_s1 }
   0x7   :  { %188 = vmatpush3.bf16.msra.mxu0 %v201_v1  ;;  %s206_s0 = scalar_lea.vmem %s152_s1, 256  ;;  %p211_p1 = scmp.lt.s32.totalorder %s152_s1, %s152_s1 }
   0x8   :  { %189 = vmatprep.subr.bf16.mxu0 %v202_v2  ;;  %p207_p0 = scmp.ne.s32.totalorder %s152_s1, %s206_s0  ;;  %p212_p2 = scmp.lt.s32.totalorder %s206_s0, %s206_s0 }
   0xa   :  { %p213_p3 = por %p212_p2, %p211_p1 }
   0xb   :  { %190 = vmatpush3.bf16.msra.mxu0 %v202_v2 }
   0xc   :  { %191 = vmatprep.subr.bf16.mxu0 %v203_v4  ;;  %p214_p4 = pnand %p213_p3, %p207_p0 }
   0xf   :  { %192 = vmatpush3.bf16.msra.mxu0 %v203_v4 }
  0x12   :  { %194 = vmatmul.mubr.msk.bf16.vlgmr.msra.gmra.mrb[0].mxu0 %vm69_vm0, %v205_v5 }
  0xe5   :  { %v195_v7 = vpop.f32.mrb[0].mxu0 }
  0xe6   :  { %v119_v8 = vadd.f32 %v195_v7, %v162_v6  ;;  %v110_v9 = vpop.f32.mrb[1].mxu0 }
  0xe7   :  { %v111_v10 = vadd.f32 %v162_v6, %v110_v9  ;;  %v196_v11 = vpop.f32.mrb[2].mxu0 }
  0xe8   :  { %v177_v12 = vpack.c.bf16 %v119_v8, %v119_v8  ;;  %v122_v13 = vadd.f32 %v196_v11, %v162_v6  ;;  %v113_v14 = vpop.f32.mrb[3].mxu0 }
  0xe9   :  { %v175_v15 = vpack.c.bf16 %v111_v10, %v111_v10  ;;  %v114_v16 = vadd.f32 %v162_v6, %v113_v14 }
  0xea   :  { %144 = vst.msk [vmem:[#allocation2 + $0x8] sm:$0xf] %vm141_vm1, %v177_v12  ;;  %v178_v17 = vpack.c.bf16 %v122_v13, %v122_v13 }
  0xeb   :  { %142 = vst.msk [vmem:[#allocation2] sm:$0xf] %vm141_vm1, %v175_v15  ;;  %v176_v18 = vpack.c.bf16 %v114_v16, %v114_v16 }
  0xec   :  { %145 = vst.msk [vmem:[#allocation2 + $0xc] sm:$0xf] %vm141_vm1, %v178_v17 }
  0xed   :  { %143 = vst.msk [vmem:[#allocation2 + $0x4] sm:$0xf] %vm141_vm1, %v176_v18 }
  0xee   :  { %217 = shalt.err (!%p214_p4)
}
  0xef   :  { %s218_s28 = scalar_lea.hbm %s293_s3, 256 }
  0xf0   :  { %p219_p5 = scmp.ne.s32.totalorder %s293_s3, %s218_s28  ;;  %p222_p6 = scmp.lt.u32.totalorder %s218_s28, %s293_s3 }
  0xf2   :  { %p224_p7 = pnand %p222_p6, %p219_p5 }
  0xf4   :  { %227 = shalt.err (!%p224_p7)
}
  0xf5   :  { %s231_s6 = smov 64   ;;  %s232_s7 = smov 4  }
  0xf6   :  { %157 = dma.vmem_to_hbm [thread:$0]  %s152_s1, 256, %s293_s3, [#allocation3], %s231_s6, %s231_s6, %s232_s7  }
  0xf7   :  { %228 = dma.done.wait [#allocation3], 256  }
  0xf8   :  { %229 = vsyncadd [#allocation3], 4294967040 }
  0xf9   :  { %161 = vsyncpa [#allocation3], 1 }

</bundles_post_ra>
